<compile_context>
chip_gen: v6e
topology: v6e:2x2x1
jax: 0.10.0
libtpu: 0.0.40
codegen_flags: <defaults>
</compile_context>

<pallas_src>
import jax
import jax.numpy as jnp
from jax.experimental import pallas as pl
from jax.experimental.pallas import tpu as pltpu

_K = 8          # JPEG block size
_LANES = 128    # vreg lanes
_SUBLANES = 8   # vreg sublanes (32-bit)


def _merge_dense_kernel(x_ref, o_ref):
    """x_ref: (TS, J, 64) [strip, j, p*8+q] -> o_ref: (TS, 8, W) [strip, p, j*8+q]."""
    ts, j_blocks, _ = x_ref.shape
    for p in range(_K):                       # static unroll: 8 rows per block
        # Contiguous 8-lane slice (all j, fixed p), then interleave (j, q)
        # into one dense lane dimension of width W = 8*J.
        o_ref[:, p, :] = x_ref[:, :, pl.ds(_K * p, _K)].reshape(ts, j_blocks * _K)


def _merge_safe_kernel(x_ref, o_ref):
    """x_ref: (TS, J, 8, 8) -> o_ref: (TS, 8, J, 8). Guaranteed-lowering layout."""
    for p in range(_K):
        o_ref[:, p, :, :] = x_ref[:, :, p, :]


def _cdiv(a, b):
    return -(-a // b)


def _round_up(n, m):
    return _cdiv(n, m) * m


def _vmem_capacity_bytes():
    try:
        return int(pltpu.get_tpu_info().vmem_capacity_bytes)
    except Exception:
        return 64 * 1024 * 1024      # conservative default (v7x per-core VMEM)


def _pick_num_strips(n_strips, per_strip_bytes, pair_budget_bytes, min_steps=4):
    """Largest strip tile whose double-buffered in+out pair fits the budget."""
    ts_vmem = max(1, pair_budget_bytes // (2 * per_strip_bytes))
    ts_steps = max(1, _cdiv(n_strips, min_steps))   # keep >= ~min_steps grid steps
    ts = max(1, min(n_strips, ts_vmem, ts_steps))
    # Prefer an even number of grid steps (v7x megacore: 2 TCs share the grid).
    g = _cdiv(n_strips, ts)
    if g > 1 and g % 2 == 1:
        ts = max(1, _cdiv(n_strips, g + 1))
    return int(ts)


def block_merging(patches, height, width):
    """patches: (B, (height//8)*(width//8), 8, 8) -> (B, height, width)."""
    k = _K
    B = patches.shape[0]
    assert height % k == 0 and width % k == 0
    I, J = height // k, width // k
    assert patches.shape[1] == I * J and patches.shape[2:] == (k, k)

    S = B * I                                   # number of 8-row strips
    itemsize = jnp.dtype(patches.dtype).itemsize
    cap = _vmem_capacity_bytes()
    pair_budget = cap // 3                      # double-buffered in+out pair
    vmem_limit = max(32 * 1024 * 1024, (cap // 4) * 3)
    cost = pl.CostEstimate(flops=0, transcendentals=0,
                           bytes_accessed=2 * S * J * k * k * itemsize)

    # ---------------- fast path: lane-dense input & output ----------------
    try:
        in_strip = _round_up(J, _SUBLANES) * _round_up(k * k, _LANES) * itemsize
        out_strip = k * _round_up(width, _LANES) * itemsize
        ts = _pick_num_strips(S, in_strip + out_strip, pair_budget)
        out = pl.pallas_call(
            _merge_dense_kernel,
            out_shape=jax.ShapeDtypeStruct((S, k, width), patches.dtype),
            grid_spec=pltpu.PrefetchScalarGridSpec(
                num_scalar_prefetch=0,
                grid=(_cdiv(S, ts),),
                in_specs=[pl.BlockSpec((ts, J, k * k), lambda i: (i, 0, 0))],
                out_specs=pl.BlockSpec((ts, k, width), lambda i: (i, 0, 0))),
            compiler_params=pltpu.CompilerParams(
                dimension_semantics=("parallel",),
                vmem_limit_bytes=vmem_limit),
            cost_estimate=cost,
        )(patches.reshape(S, J, k * k))          # free (contiguous) reshape
        out = jax.block_until_ready(out)
        return out.reshape(B, height, width)     # free (contiguous) reshape
    except Exception:
        # Mosaic in this JAX version can't lower the sublane->lane interleave;
        # fall back to the validated 8-wide-minor layout (same tiling gains).
        pass

    # --------- fallback: layout already validated to lower on TPU ---------
    in_strip = J * _SUBLANES * _LANES * itemsize                 # (8,8) tiles, lane padded
    out_strip = k * _round_up(J, _SUBLANES) * _LANES * itemsize  # (J,8) tiles, lane padded
    ts = _pick_num_strips(S, in_strip + out_strip, pair_budget)
    out = pl.pallas_call(
        _merge_safe_kernel,
        out_shape=jax.ShapeDtypeStruct((S, k, J, k), patches.dtype),
        grid_spec=pltpu.PrefetchScalarGridSpec(
            num_scalar_prefetch=0,
            grid=(_cdiv(S, ts),),
            in_specs=[pl.BlockSpec((ts, J, k, k), lambda i: (i, 0, 0, 0))],
            out_specs=pl.BlockSpec((ts, k, J, k), lambda i: (i, 0, 0, 0))),
        compiler_params=pltpu.CompilerParams(
            dimension_semantics=("parallel",),
            vmem_limit_bytes=vmem_limit),
        cost_estimate=cost,
    )(patches.reshape(S, J, k, k))               # free (contiguous) reshape
    return out.reshape(B, height, width)         # free (contiguous) reshape


def _reference(patches, height, width):
    k = _K
    B = patches.shape[0]
    return jnp.transpose(
        patches.reshape(B, height // k, width // k, k, k), (0, 1, 3, 2, 4)
    ).reshape(B, height, width)


if __name__ == "__main__":
    k = _K
    key = jax.random.PRNGKey(0)

    # Small case from the module spec: batch=2, 16x16 image -> 4 patches of 8x8.
    B, H, W = 2, 16, 16
    patches = jax.random.uniform(
        key, (B, (H // k) * (W // k), k, k), dtype=jnp.float32) * 255.0
    out = jax.block_until_ready(block_merging(patches, H, W))
    assert out.shape == (B, H, W)
    assert bool(jnp.array_equal(out, _reference(patches, H, W)))

    # Wider case exercising the lane-dense (W % 128 == 0) output path.
    B2, H2, W2 = 2, 16, 256
    patches2 = jax.random.uniform(
        jax.random.PRNGKey(0), (B2, (H2 // k) * (W2 // k), k, k),
        dtype=jnp.float32) * 255.0
    out2 = jax.block_until_ready(block_merging(patches2, H2, W2))
    assert out2.shape == (B2, H2, W2)
    assert bool(jnp.array_equal(out2, _reference(patches2, H2, W2)))

    print("KERNEL_OK")
</pallas_src>

<mosaic_0001>
module attributes {stable_mosaic.version = 11 : i64} {
  func.func @_merge_dense_kernel(%arg0: i32, %arg1: memref<1x2x64xf32, #tpu.memory_space<vmem>>, %arg2: memref<1x8x16xf32, #tpu.memory_space<vmem>>) attributes {dimension_semantics = [#tpu.dimension_semantics<parallel>], iteration_bounds = array<i64: 4>, scalar_prefetch = 0 : i64, scratch_operands = 0 : i64, tpu.core_type = #tpu.core_type<tc>, window_params = [{transform_indices = @transform_0, window_bounds = array<i64: 1, 2, 64>}, {transform_indices = @transform_1, window_bounds = array<i64: 1, 8, 16>}]} {
    %c0 = arith.constant 0 : index
    %c0_0 = arith.constant 0 : index
    %c0_1 = arith.constant 0 : index
    %0 = vector.load %arg1[%c0, %c0_0, %c0_1] : memref<1x2x64xf32, #tpu.memory_space<vmem>>, vector<1x2x8xf32>
    %1 = vector.shape_cast %0 : vector<1x2x8xf32> to vector<1x16xf32>
    %c0_2 = arith.constant 0 : index
    %c0_3 = arith.constant 0 : index
    %c0_4 = arith.constant 0 : index
    %2 = vector.load %arg2[%c0_2, %c0_3, %c0_4] : memref<1x8x16xf32, #tpu.memory_space<vmem>>, vector<1x1x16xf32>
    %3 = vector.shape_cast %2 : vector<1x1x16xf32> to vector<1x16xf32>
    %4 = vector.shape_cast %1 : vector<1x16xf32> to vector<1x1x16xf32>
    tpu.vector_store %arg2[%c0_2, %c0_3, %c0_4], %4 {strides = array<i32>} : memref<1x8x16xf32, #tpu.memory_space<vmem>>, vector<1x1x16xf32>,
    %c0_5 = arith.constant 0 : index
    %c0_6 = arith.constant 0 : index
    %c8 = arith.constant 8 : index
    %5 = vector.load %arg1[%c0_5, %c0_6, %c8] : memref<1x2x64xf32, #tpu.memory_space<vmem>>, vector<1x2x8xf32>
    %6 = vector.shape_cast %5 : vector<1x2x8xf32> to vector<1x16xf32>
    %c0_7 = arith.constant 0 : index
    %c1 = arith.constant 1 : index
    %c0_8 = arith.constant 0 : index
    %7 = vector.load %arg2[%c0_7, %c1, %c0_8] : memref<1x8x16xf32, #tpu.memory_space<vmem>>, vector<1x1x16xf32>
    %8 = vector.shape_cast %7 : vector<1x1x16xf32> to vector<1x16xf32>
    %9 = vector.shape_cast %6 : vector<1x16xf32> to vector<1x1x16xf32>
    tpu.vector_store %arg2[%c0_7, %c1, %c0_8], %9 {strides = array<i32>} : memref<1x8x16xf32, #tpu.memory_space<vmem>>, vector<1x1x16xf32>,
    %c0_9 = arith.constant 0 : index
    %c0_10 = arith.constant 0 : index
    %c16 = arith.constant 16 : index
    %10 = vector.load %arg1[%c0_9, %c0_10, %c16] : memref<1x2x64xf32, #tpu.memory_space<vmem>>, vector<1x2x8xf32>
    %11 = vector.shape_cast %10 : vector<1x2x8xf32> to vector<1x16xf32>
    %c0_11 = arith.constant 0 : index
    %c2 = arith.constant 2 : index
    %c0_12 = arith.constant 0 : index
    %12 = vector.load %arg2[%c0_11, %c2, %c0_12] : memref<1x8x16xf32, #tpu.memory_space<vmem>>, vector<1x1x16xf32>
    %13 = vector.shape_cast %12 : vector<1x1x16xf32> to vector<1x16xf32>
    %14 = vector.shape_cast %11 : vector<1x16xf32> to vector<1x1x16xf32>
    tpu.vector_store %arg2[%c0_11, %c2, %c0_12], %14 {strides = array<i32>} : memref<1x8x16xf32, #tpu.memory_space<vmem>>, vector<1x1x16xf32>,
    %c0_13 = arith.constant 0 : index
    %c0_14 = arith.constant 0 : index
    %c24 = arith.constant 24 : index
    %15 = vector.load %arg1[%c0_13, %c0_14, %c24] : memref<1x2x64xf32, #tpu.memory_space<vmem>>, vector<1x2x8xf32>
    %16 = vector.shape_cast %15 : vector<1x2x8xf32> to vector<1x16xf32>
    %c0_15 = arith.constant 0 : index
    %c3 = arith.constant 3 : index
    %c0_16 = arith.constant 0 : index
    %17 = vector.load %arg2[%c0_15, %c3, %c0_16] : memref<1x8x16xf32, #tpu.memory_space<vmem>>, vector<1x1x16xf32>
    %18 = vector.shape_cast %17 : vector<1x1x16xf32> to vector<1x16xf32>
    %19 = vector.shape_cast %16 : vector<1x16xf32> to vector<1x1x16xf32>
    tpu.vector_store %arg2[%c0_15, %c3, %c0_16], %19 {strides = array<i32>} : memref<1x8x16xf32, #tpu.memory_space<vmem>>, vector<1x1x16xf32>,
    %c0_17 = arith.constant 0 : index
    %c0_18 = arith.constant 0 : index
    %c32 = arith.constant 32 : index
    %20 = vector.load %arg1[%c0_17, %c0_18, %c32] : memref<1x2x64xf32, #tpu.memory_space<vmem>>, vector<1x2x8xf32>
    %21 = vector.shape_cast %20 : vector<1x2x8xf32> to vector<1x16xf32>
    %c0_19 = arith.constant 0 : index
    %c4 = arith.constant 4 : index
    %c0_20 = arith.constant 0 : index
    %22 = vector.load %arg2[%c0_19, %c4, %c0_20] : memref<1x8x16xf32, #tpu.memory_space<vmem>>, vector<1x1x16xf32>
    %23 = vector.shape_cast %22 : vector<1x1x16xf32> to vector<1x16xf32>
    %24 = vector.shape_cast %21 : vector<1x16xf32> to vector<1x1x16xf32>
    tpu.vector_store %arg2[%c0_19, %c4, %c0_20], %24 {strides = array<i32>} : memref<1x8x16xf32, #tpu.memory_space<vmem>>, vector<1x1x16xf32>,
    %c0_21 = arith.constant 0 : index
    %c0_22 = arith.constant 0 : index
    %c40 = arith.constant 40 : index
    %25 = vector.load %arg1[%c0_21, %c0_22, %c40] : memref<1x2x64xf32, #tpu.memory_space<vmem>>, vector<1x2x8xf32>
    %26 = vector.shape_cast %25 : vector<1x2x8xf32> to vector<1x16xf32>
    %c0_23 = arith.constant 0 : index
    %c5 = arith.constant 5 : index
    %c0_24 = arith.constant 0 : index
    %27 = vector.load %arg2[%c0_23, %c5, %c0_24] : memref<1x8x16xf32, #tpu.memory_space<vmem>>, vector<1x1x16xf32>
    %28 = vector.shape_cast %27 : vector<1x1x16xf32> to vector<1x16xf32>
    %29 = vector.shape_cast %26 : vector<1x16xf32> to vector<1x1x16xf32>
    tpu.vector_store %arg2[%c0_23, %c5, %c0_24], %29 {strides = array<i32>} : memref<1x8x16xf32, #tpu.memory_space<vmem>>, vector<1x1x16xf32>,
    %c0_25 = arith.constant 0 : index
    %c0_26 = arith.constant 0 : index
    %c48 = arith.constant 48 : index
    %30 = vector.load %arg1[%c0_25, %c0_26, %c48] : memref<1x2x64xf32, #tpu.memory_space<vmem>>, vector<1x2x8xf32>
    %31 = vector.shape_cast %30 : vector<1x2x8xf32> to vector<1x16xf32>
    %c0_27 = arith.constant 0 : index
    %c6 = arith.constant 6 : index
    %c0_28 = arith.constant 0 : index
    %32 = vector.load %arg2[%c0_27, %c6, %c0_28] : memref<1x8x16xf32, #tpu.memory_space<vmem>>, vector<1x1x16xf32>
    %33 = vector.shape_cast %32 : vector<1x1x16xf32> to vector<1x16xf32>
    %34 = vector.shape_cast %31 : vector<1x16xf32> to vector<1x1x16xf32>
    tpu.vector_store %arg2[%c0_27, %c6, %c0_28], %34 {strides = array<i32>} : memref<1x8x16xf32, #tpu.memory_space<vmem>>, vector<1x1x16xf32>,
    %c0_29 = arith.constant 0 : index
    %c0_30 = arith.constant 0 : index
    %c56 = arith.constant 56 : index
    %35 = vector.load %arg1[%c0_29, %c0_30, %c56] : memref<1x2x64xf32, #tpu.memory_space<vmem>>, vector<1x2x8xf32>
    %36 = vector.shape_cast %35 : vector<1x2x8xf32> to vector<1x16xf32>
    %c0_31 = arith.constant 0 : index
    %c7 = arith.constant 7 : index
    %c0_32 = arith.constant 0 : index
    %37 = vector.load %arg2[%c0_31, %c7, %c0_32] : memref<1x8x16xf32, #tpu.memory_space<vmem>>, vector<1x1x16xf32>
    %38 = vector.shape_cast %37 : vector<1x1x16xf32> to vector<1x16xf32>
    %39 = vector.shape_cast %36 : vector<1x16xf32> to vector<1x1x16xf32>
    tpu.vector_store %arg2[%c0_31, %c7, %c0_32], %39 {strides = array<i32>} : memref<1x8x16xf32, #tpu.memory_space<vmem>>, vector<1x1x16xf32>,
    return
  }
  func.func @transform_0(%arg0: i32) -> (i32, i32, i32) {
    %c0_i32 = arith.constant 0 : i32
    %c0_i32_0 = arith.constant 0 : i32
    %c0_i32_1 = arith.constant 0 : i32
    return %arg0, %c0_i32, %c0_i32_0 : i32, i32, i32
  }
  func.func @transform_1(%arg0: i32) -> (i32, i32, i32) {
    %c0_i32 = arith.constant 0 : i32
    %c0_i32_0 = arith.constant 0 : i32
    %c0_i32_1 = arith.constant 0 : i32
    return %arg0, %c0_i32, %c0_i32_0 : i32, i32, i32
  }
}

module attributes {stable_mosaic.version = 11 : i64} {
  func.func @_merge_safe_kernel(%arg0: i32, %arg1: memref<1x2x8x8xf32, #tpu.memory_space<vmem>>, %arg2: memref<1x8x2x8xf32, #tpu.memory_space<vmem>>) attributes {dimension_semantics = [#tpu.dimension_semantics<parallel>], iteration_bounds = array<i64: 4>, scalar_prefetch = 0 : i64, scratch_operands = 0 : i64, tpu.core_type = #tpu.core_type<tc>, window_params = [{transform_indices = @transform_0, window_bounds = array<i64: 1, 2, 8, 8>}, {transform_indices = @transform_1, window_bounds = array<i64: 1, 8, 2, 8>}]} {
    %c0 = arith.constant 0 : index
    %c0_0 = arith.constant 0 : index
    %c0_1 = arith.constant 0 : index
    %c0_2 = arith.constant 0 : index
    %0 = vector.load %arg1[%c0, %c0_0, %c0_1, %c0_2] : memref<1x2x8x8xf32, #tpu.memory_space<vmem>>, vector<1x2x1x8xf32>
    %1 = vector.shape_cast %0 : vector<1x2x1x8xf32> to vector<1x2x8xf32>
    %c0_3 = arith.constant 0 : index
    %c0_4 = arith.constant 0 : index
    %c0_5 = arith.constant 0 : index
    %c0_6 = arith.constant 0 : index
    %2 = vector.load %arg2[%c0_3, %c0_4, %c0_5, %c0_6] : memref<1x8x2x8xf32, #tpu.memory_space<vmem>>, vector<1x1x2x8xf32>
    %3 = vector.shape_cast %2 : vector<1x1x2x8xf32> to vector<1x2x8xf32>
    %4 = vector.shape_cast %1 : vector<1x2x8xf32> to vector<1x1x2x8xf32>
    tpu.vector_store %arg2[%c0_3, %c0_4, %c0_5, %c0_6], %4 {strides = array<i32>} : memref<1x8x2x8xf32, #tpu.memory_space<vmem>>, vector<1x1x2x8xf32>,
    %c0_7 = arith.constant 0 : index
    %c0_8 = arith.constant 0 : index
    %c1 = arith.constant 1 : index
    %c0_9 = arith.constant 0 : index
    %5 = vector.load %arg1[%c0_7, %c0_8, %c1, %c0_9] : memref<1x2x8x8xf32, #tpu.memory_space<vmem>>, vector<1x2x1x8xf32>
    %6 = vector.shape_cast %5 : vector<1x2x1x8xf32> to vector<1x2x8xf32>
    %c0_10 = arith.constant 0 : index
    %c1_11 = arith.constant 1 : index
    %c0_12 = arith.constant 0 : index
    %c0_13 = arith.constant 0 : index
    %7 = vector.load %arg2[%c0_10, %c1_11, %c0_12, %c0_13] : memref<1x8x2x8xf32, #tpu.memory_space<vmem>>, vector<1x1x2x8xf32>
    %8 = vector.shape_cast %7 : vector<1x1x2x8xf32> to vector<1x2x8xf32>
    %9 = vector.shape_cast %6 : vector<1x2x8xf32> to vector<1x1x2x8xf32>
    tpu.vector_store %arg2[%c0_10, %c1_11, %c0_12, %c0_13], %9 {strides = array<i32>} : memref<1x8x2x8xf32, #tpu.memory_space<vmem>>, vector<1x1x2x8xf32>,
    %c0_14 = arith.constant 0 : index
    %c0_15 = arith.constant 0 : index
    %c2 = arith.constant 2 : index
    %c0_16 = arith.constant 0 : index
    %10 = vector.load %arg1[%c0_14, %c0_15, %c2, %c0_16] : memref<1x2x8x8xf32, #tpu.memory_space<vmem>>, vector<1x2x1x8xf32>
    %11 = vector.shape_cast %10 : vector<1x2x1x8xf32> to vector<1x2x8xf32>
    %c0_17 = arith.constant 0 : index
    %c2_18 = arith.constant 2 : index
    %c0_19 = arith.constant 0 : index
    %c0_20 = arith.constant 0 : index
    %12 = vector.load %arg2[%c0_17, %c2_18, %c0_19, %c0_20] : memref<1x8x2x8xf32, #tpu.memory_space<vmem>>, vector<1x1x2x8xf32>
    %13 = vector.shape_cast %12 : vector<1x1x2x8xf32> to vector<1x2x8xf32>
    %14 = vector.shape_cast %11 : vector<1x2x8xf32> to vector<1x1x2x8xf32>
    tpu.vector_store %arg2[%c0_17, %c2_18, %c0_19, %c0_20], %14 {strides = array<i32>} : memref<1x8x2x8xf32, #tpu.memory_space<vmem>>, vector<1x1x2x8xf32>,
    %c0_21 = arith.constant 0 : index
    %c0_22 = arith.constant 0 : index
    %c3 = arith.constant 3 : index
    %c0_23 = arith.constant 0 : index
    %15 = vector.load %arg1[%c0_21, %c0_22, %c3, %c0_23] : memref<1x2x8x8xf32, #tpu.memory_space<vmem>>, vector<1x2x1x8xf32>
    %16 = vector.shape_cast %15 : vector<1x2x1x8xf32> to vector<1x2x8xf32>
    %c0_24 = arith.constant 0 : index
    %c3_25 = arith.constant 3 : index
    %c0_26 = arith.constant 0 : index
    %c0_27 = arith.constant 0 : index
    %17 = vector.load %arg2[%c0_24, %c3_25, %c0_26, %c0_27] : memref<1x8x2x8xf32, #tpu.memory_space<vmem>>, vector<1x1x2x8xf32>
    %18 = vector.shape_cast %17 : vector<1x1x2x8xf32> to vector<1x2x8xf32>
    %19 = vector.shape_cast %16 : vector<1x2x8xf32> to vector<1x1x2x8xf32>
    tpu.vector_store %arg2[%c0_24, %c3_25, %c0_26, %c0_27], %19 {strides = array<i32>} : memref<1x8x2x8xf32, #tpu.memory_space<vmem>>, vector<1x1x2x8xf32>,
    %c0_28 = arith.constant 0 : index
    %c0_29 = arith.constant 0 : index
    %c4 = arith.constant 4 : index
    %c0_30 = arith.constant 0 : index
    %20 = vector.load %arg1[%c0_28, %c0_29, %c4, %c0_30] : memref<1x2x8x8xf32, #tpu.memory_space<vmem>>, vector<1x2x1x8xf32>
    %21 = vector.shape_cast %20 : vector<1x2x1x8xf32> to vector<1x2x8xf32>
    %c0_31 = arith.constant 0 : index
    %c4_32 = arith.constant 4 : index
    %c0_33 = arith.constant 0 : index
    %c0_34 = arith.constant 0 : index
    %22 = vector.load %arg2[%c0_31, %c4_32, %c0_33, %c0_34] : memref<1x8x2x8xf32, #tpu.memory_space<vmem>>, vector<1x1x2x8xf32>
    %23 = vector.shape_cast %22 : vector<1x1x2x8xf32> to vector<1x2x8xf32>
    %24 = vector.shape_cast %21 : vector<1x2x8xf32> to vector<1x1x2x8xf32>
    tpu.vector_store %arg2[%c0_31, %c4_32, %c0_33, %c0_34], %24 {strides = array<i32>} : memref<1x8x2x8xf32, #tpu.memory_space<vmem>>, vector<1x1x2x8xf32>,
    %c0_35 = arith.constant 0 : index
    %c0_36 = arith.constant 0 : index
    %c5 = arith.constant 5 : index
    %c0_37 = arith.constant 0 : index
    %25 = vector.load %arg1[%c0_35, %c0_36, %c5, %c0_37] : memref<1x2x8x8xf32, #tpu.memory_space<vmem>>, vector<1x2x1x8xf32>
    %26 = vector.shape_cast %25 : vector<1x2x1x8xf32> to vector<1x2x8xf32>
    %c0_38 = arith.constant 0 : index
    %c5_39 = arith.constant 5 : index
    %c0_40 = arith.constant 0 : index
    %c0_41 = arith.constant 0 : index
    %27 = vector.load %arg2[%c0_38, %c5_39, %c0_40, %c0_41] : memref<1x8x2x8xf32, #tpu.memory_space<vmem>>, vector<1x1x2x8xf32>
    %28 = vector.shape_cast %27 : vector<1x1x2x8xf32> to vector<1x2x8xf32>
    %29 = vector.shape_cast %26 : vector<1x2x8xf32> to vector<1x1x2x8xf32>
    tpu.vector_store %arg2[%c0_38, %c5_39, %c0_40, %c0_41], %29 {strides = array<i32>} : memref<1x8x2x8xf32, #tpu.memory_space<vmem>>, vector<1x1x2x8xf32>,
    %c0_42 = arith.constant 0 : index
    %c0_43 = arith.constant 0 : index
    %c6 = arith.constant 6 : index
    %c0_44 = arith.constant 0 : index
    %30 = vector.load %arg1[%c0_42, %c0_43, %c6, %c0_44] : memref<1x2x8x8xf32, #tpu.memory_space<vmem>>, vector<1x2x1x8xf32>
    %31 = vector.shape_cast %30 : vector<1x2x1x8xf32> to vector<1x2x8xf32>
    %c0_45 = arith.constant 0 : index
    %c6_46 = arith.constant 6 : index
    %c0_47 = arith.constant 0 : index
    %c0_48 = arith.constant 0 : index
    %32 = vector.load %arg2[%c0_45, %c6_46, %c0_47, %c0_48] : memref<1x8x2x8xf32, #tpu.memory_space<vmem>>, vector<1x1x2x8xf32>
    %33 = vector.shape_cast %32 : vector<1x1x2x8xf32> to vector<1x2x8xf32>
    %34 = vector.shape_cast %31 : vector<1x2x8xf32> to vector<1x1x2x8xf32>
    tpu.vector_store %arg2[%c0_45, %c6_46, %c0_47, %c0_48], %34 {strides = array<i32>} : memref<1x8x2x8xf32, #tpu.memory_space<vmem>>, vector<1x1x2x8xf32>,
    %c0_49 = arith.constant 0 : index
    %c0_50 = arith.constant 0 : index
    %c7 = arith.constant 7 : index
    %c0_51 = arith.constant 0 : index
    %35 = vector.load %arg1[%c0_49, %c0_50, %c7, %c0_51] : memref<1x2x8x8xf32, #tpu.memory_space<vmem>>, vector<1x2x1x8xf32>
    %36 = vector.shape_cast %35 : vector<1x2x1x8xf32> to vector<1x2x8xf32>
    %c0_52 = arith.constant 0 : index
    %c7_53 = arith.constant 7 : index
    %c0_54 = arith.constant 0 : index
    %c0_55 = arith.constant 0 : index
    %37 = vector.load %arg2[%c0_52, %c7_53, %c0_54, %c0_55] : memref<1x8x2x8xf32, #tpu.memory_space<vmem>>, vector<1x1x2x8xf32>
    %38 = vector.shape_cast %37 : vector<1x1x2x8xf32> to vector<1x2x8xf32>
    %39 = vector.shape_cast %36 : vector<1x2x8xf32> to vector<1x1x2x8xf32>
    tpu.vector_store %arg2[%c0_52, %c7_53, %c0_54, %c0_55], %39 {strides = array<i32>} : memref<1x8x2x8xf32, #tpu.memory_space<vmem>>, vector<1x1x2x8xf32>,
    return
  }
  func.func @transform_0(%arg0: i32) -> (i32, i32, i32, i32) {
    %c0_i32 = arith.constant 0 : i32
    %c0_i32_0 = arith.constant 0 : i32
    %c0_i32_1 = arith.constant 0 : i32
    %c0_i32_2 = arith.constant 0 : i32
    return %arg0, %c0_i32, %c0_i32_0, %c0_i32_1 : i32, i32, i32, i32
  }
  func.func @transform_1(%arg0: i32) -> (i32, i32, i32, i32) {
    %c0_i32 = arith.constant 0 : i32
    %c0_i32_0 = arith.constant 0 : i32
    %c0_i32_1 = arith.constant 0 : i32
    %c0_i32_2 = arith.constant 0 : i32
    return %arg0, %c0_i32, %c0_i32_0, %c0_i32_1 : i32, i32, i32, i32
  }
}

</mosaic_0001>

<bundles_post_ra>
// kernel: tpu_custom_call.1
= control target key start
LH: loop header
LB: loop body
LE: loop exit
PB: predicated region body
PF: predicated region fallthrough
CT: control target
= control target key end

     0   :  { %6 = vsyncpa [#allocation3], 0  ;;  %s727_s0 = inlined_call_operand.hbm [shape: f32[4,2,64], index: 0, kind: input, shape index: {}]   ;;  %s728_s1 = inlined_call_operand.hbm [shape: f32[4,8,16], index: 1, kind: output, shape index: {}]  }
   0x1   :  { %8 = vsyncpa [#allocation3 + $0x1], 0 }
   0x2   :  { %9 = vsyncpa [#allocation4], 0 }
   0x3   :  { %11 = vsyncpa [#allocation4 + $0x1], 0  ;;  %s551_s6 = smov 0   ;;  %s553_s7 = smov 0  }
   0x4   :  { %s555_s8 = smov 0   ;;  %s557_s9 = smov 0  }
   0x5 LB: > { %s572_s10 = sadd.s32 4294967295, %s527_s9   ;;  %s366_s11 = sadd.s32 4294967294, %s527_s9   ;;  %s527_s9 = sphi %s557_s9, %s744_s9   ;;  %s523_s8 = sphi %s555_s8, %s743_s8   ;;  %s519_s7 = sphi %s553_s7, %s742_s7   ;;  %s515_s6 = sphi %s551_s6, %s741_s6  }
   0x6   : > { %s576_s12 = sadd.s32 1, %s527_s9   ;;  %s24_s13 = sadd.s32 1, %s523_s8 }
   0x7   : > { %s21_s14 = ssub.s32 %s527_s9, %s576_s12  ;;  %p31_p0 = scmp.ne.s32.totalorder %s523_s8, %s519_s7 }
   0x8   : > { %p22_p1 = scmp.eq.s32.totalorder %s21_s14, 0  ;;  %p32_p2 = scmp.eq.s32.totalorder %s527_s9, 0 }
   0x9   : > { %p37_p3 = scmp.ne.s32.totalorder %s519_s7, %s515_s6  ;;  %p38_p4 = scmp.eq.s32.totalorder %s572_s10, 0 }
   0xa   : > { %s588_s15 = scalar_select %p22_p1, %s523_s8, %s24_s13  }
   0xb   : > { %p590_p5 = por %p32_p2, %p31_p0  ;;  %p594_p6 = por %p38_p4, %p37_p3 }
   0xc   : > { %p61_p7 = scmp.eq.s32.totalorder %s572_s10, 3  ;;  %p67_p8 = scmp.eq.s32.totalorder %s366_s11, 3 }
   0xd   : > { %s732_s17 = scalar_select %p594_p6, 1, 0 }
   0xe   : > { %p391_p9 = scmp.lt.s32.totalorder %s527_s9, 4  ;;  %p600_p10 = por %p61_p7, %p31_p0 }
   0xf   : > { %p604_p11 = por %p67_p8, %p37_p3  ;;  %s87_s20 = sand.u32 1, %s523_s8  }
  0x10   : > { %s733_s18 = scalar_select %p600_p10, 1, 0 }
  0x11   : > { %s734_s19 = scalar_select %p604_p11, 1, 0 }
  0x12   : > { %s370_s21 = sshll.u32 %s527_s9, 5  ;;  %s369_s22 = sshll.u32 %s87_s20, 1 }
  0x13   : > { %s613_s25 = scalar_lea.hbm %s727_s0, %s370_s21  ;;  %s91_s26 = scalar_lea.vmem [#allocation2], %s369_s22 }
  0x14   : > { %s98_s27 = sshll.u32 %s91_s26, 4  ;;  %p617_p12 = pnand %p391_p9, %p590_p5  ;;  %s621_s27 = int_to_ptr.vmem [resolvable:$true] %s98_s27 }
  0x15   : > { %s88_s29 = scalar_lea.sflag [#allocation3], %s87_s20  ;;  %s435_s30 = scalar_lea.hbm %s613_s25, 32 }
  0x16   : > { %p436_p1 = scmp.ne.s32.totalorder %s613_s25, %s435_s30  ;;  %p437_p2 = pneg %p617_p12 }
  0x17   : > { %s440_s4 = scalar_lea.hbm %s727_s0, 128  ;;  %p441_p5 = scmp.lt.s32.totalorder %s613_s25, %s727_s0 }
  0x18   : > { %p438_p3 = pnand %p437_p2, %p436_p1  ;;  %p442_p7 = scmp.lt.s32.totalorder %s440_s4, %s435_s30 }
  0x1a   : > { %p439_p4 = pneg %p438_p3  ;;  %p443_p8 = por %p442_p7, %p441_p5 }
  0x1c   : > { %p444_p9 = pnand %p443_p8, %p439_p4 }
  0x1e   : > { %447 = shalt.err (!%p444_p9)
}
  0x1f   : > { %s448_s13 = scalar_lea.vmem %s621_s27, 32  ;;  %s529_s14 = smov [#allocation2]  }
  0x20   : > { %p449_p13 = scmp.ne.s32.totalorder %s621_s27, %s448_s13  ;;  %s453_s16 = sshll.u32 %s529_s14, 4  ;;  %s454_s16 = int_to_ptr.vmem [resolvable:$false] %s453_s16 }
  0x21   : > { %s455_s20 = scalar_lea.vmem %s454_s16, 64  ;;  %p456_p3 = scmp.lt.s32.totalorder %s621_s27, %s454_s16 }
  0x22   : > { %p451_p0 = pnand %p449_p13, %p437_p2  ;;  %p457_p11 = scmp.lt.s32.totalorder %s455_s20, %s448_s13 }
  0x24   : > { %p452_p1 = pneg %p451_p0  ;;  %p458_p10 = por %p457_p11, %p456_p3 }
  0x26   : > { %p459_p6 = pnand %p458_p10, %p452_p1 }
  0x28   : > { %462 = shalt.err (!%p459_p6)
}
  0x29   : > { %386 = dma.hbm_to_vmem [thread:$0]  (!%p617_p12), %s613_s25, 32, %s621_s27, %s88_s29  }
  0x2a   : > { %p736_p4 = scmp.lt.s32.totalorder %s527_s9, 5  ;;  %p737_p5 = scmp.ge.s32.totalorder %s527_s9, 1 }
  0x2c   : > { %p104_p13 = pnand %p737_p5, %p736_p4 }
  0x2d   : > { %s648_s21 = sand.u32 (!%p104_p13), 1, %s519_s7   ;;  %p738_p6 = scmp.ne.s32.totalorder (!%p104_p13), %s732_s17, 0 }
  0x2e   : > { %107 = sbr.rel (%p104_p13) target bundleno = 313 (0x139), region = 24  ;;  %s372_s22 = sshll.u32 (!%p104_p13), %s648_s21, 1 }
  0x2f   : > { %s110_s23 = scalar_lea.sflag (!%p104_p13), [#allocation3], %s648_s21  ;;  %s113_s24 = scalar_lea.vmem (!%p104_p13), [#allocation2], %s372_s22 }
  0x33   : > { %506 = dma.done.wait (%p738_p6), %s110_s23, 32  }
  0x34   : > { %508 = vsyncadd (%p738_p6), %s110_s23, 4294967264  ;;  %v149_v0 = vld [vmem:[%s113_s24] sm:$0x3]  ;;  %s530_s25 = smov 120   ;;  %s531_s26 = smov 104   ;;  %v536_v7 = vmov 0.0   ;;  %v157_v12 = vlaneseq }
  0x35   : > { %v187_v1 = vld [vmem:[%s113_s24] sm:$0x3]  ;;  %151 = vrot.lane.b32.xlu0 %v149_v0, %s530_s25  ;;  %s532_s27 = smov 112   ;;  %s533_s28 = smov 96   ;;  %v539_v10 = vmov 1934713408  }
  0x36   : > { %189 = vrot.lane.b32.xlu1 %v187_v1, %s531_s26  ;;  %v168_v2 = vld [vmem:[%s113_s24] sm:$0x3]  ;;  %s534_s29 = smov 88   ;;  %s535_s30 = smov 80   ;;  %v155_v11 = vunpack.c.l.s4 %v539_v10  ;;  %v158_v14 = vshrl.u32 %v157_v12, 7  ;;  %vm145_vm0 = vcmask 64512  }
  0x37   : > { %v206_v3 = vld [vmem:[%s113_s24] sm:$0x3]  ;;  %s537_s17 = smov 72   ;;  %s538_s2 = smov 8   ;;  %vm147_vm1 = vcmask 122880  }
  0x38   : > { %v225_v4 = vld [vmem:[%s113_s24] sm:$0x3]  ;;  %v156_v13 = vunpack.c.0.s8 %v155_v11  ;;  %s373_s3 = sshll.u32 %s648_s21, 3  ;;  %s376_s5 = sshll.u32 %s572_s10, 7 }
  0x39   : > { %170 = vrot.lane.b32.xlu0 %v168_v2, %s532_s27  ;;  %v244_v5 = vld [vmem:[%s113_s24] sm:$0x3]  ;;  %s131_s4 = scalar_lea.vmem [#allocation5], %s373_s3  ;;  %s681_s16 = scalar_lea.hbm %s728_s1, %s376_s5 }
  0x3a   : > { %208 = vrot.lane.b32.xlu1 %v206_v3, %s533_s28  ;;  %v374_v6 = vld.sshfl [vmem:[%s113_s24] sm:$0x11 pattern:$0x73516240]  ;;  %v159_v15 = vsub.s32 %v156_v13, %v158_v14  ;;  %s296_s11 = sshll.u32 %s131_s4, 4  ;;  %s283_s10 = scalar_lea.sflag [#allocation4], %s648_s21  ;;  %s683_s11 = int_to_ptr.vmem [resolvable:$true] %s296_s11 }
  0x3b   : > { %v140_v8 = vcombine.high %v374_v6, %v536_v7  ;;  %v263_v9 = vld [vmem:[%s113_s24] sm:$0x3]  ;;  %s463_s20 = scalar_lea.vmem %s683_s11, 128  ;;  %p739_p11 = scmp.ne.s32.totalorder %s733_s18, 0 }
  0x3c   : > { %p464_p10 = scmp.ne.s32.totalorder %s683_s11, %s463_s20  ;;  %s540_s22 = smov [#allocation5]  }
  0x3d   : > { %227 = vrot.lane.b32.xlu0 %v225_v4, %s534_s29  ;;  %s467_s23 = sshll.u32 %s540_s22, 4  ;;  %s468_s23 = int_to_ptr.vmem [resolvable:$false] %s467_s23 }
  0x3e   : > { %246 = vrot.lane.b32.xlu1 %v244_v5, %s535_s30  ;;  %p465_p12 = pnand %p464_p10, %p739_p11  ;;  %s469_s24 = scalar_lea.vmem %s468_s23, 256 }
  0x3f   : > { %p470_p2 = scmp.lt.s32.totalorder %s683_s11, %s468_s23  ;;  %p471_p7 = scmp.lt.s32.totalorder %s469_s24, %s463_s20 }
  0x40   : > { %p466_p0 = pneg %p465_p12 }
  0x41   : > { %265 = vrot.lane.b32.xlu0 %v263_v9, %s537_s17  ;;  %p472_p8 = por %p471_p7, %p470_p2 }
  0x42   : > { %142 = vrot.lane.b32.xlu1 %v140_v8, %s538_s2 }
  0x43   : > { %p473_p9 = pnand %p472_p8, %p466_p0 }
  0xa7   : > { %v152_v16 = vpop.permute.xlu0 %151 }
  0xa8   : > { %v190_v17 = vpop.permute.xlu1 %189  ;;  %v160_v18 = vrot.slane %v152_v16, %v159_v15 }
  0xa9   : > { %v198_v19 = vrot.slane %v190_v17, %v159_v15 }
  0xaa   : > { %v161_v20 = vcombine.high %v160_v18, %v536_v7 }
  0xab   : > { %v171_v21 = vpop.permute.xlu0 %170  ;;  %v199_v23 = vcombine.high %v198_v19, %v536_v7 }
  0xac   : > { %v209_v22 = vpop.permute.xlu1 %208  ;;  %v179_v24 = vrot.slane %v171_v21, %v159_v15  ;;  %163 = vrot.lane.b32.xlu0 %v161_v20, %s538_s2 }
  0xad   : > { %v217_v25 = vrot.slane %v209_v22, %v159_v15 }
  0xae   : > { %v180_v26 = vcombine.high %v179_v24, %v536_v7 }
  0xaf   : > { %v228_v27 = vpop.permute.xlu0 %227  ;;  %v218_v29 = vcombine.high %v217_v25, %v536_v7 }
  0xb0   : > { %v247_v28 = vpop.permute.xlu1 %246  ;;  %v236_v30 = vrot.slane %v228_v27, %v159_v15  ;;  %201 = vrot.lane.b32.xlu0 %v199_v23, %s538_s2  ;;  %182 = vrot.lane.b32.xlu1 %v180_v26, %s538_s2 }
  0xb1   : > { %v255_v31 = vrot.slane %v247_v28, %v159_v15 }
  0xb2   : > { %v237_v32 = vcombine.high %v236_v30, %v536_v7 }
  0xb3   : > { %v266_v33 = vpop.permute.xlu0 %265  ;;  %v256_v35 = vcombine.high %v255_v31, %v536_v7 }
  0xb4   : > { %v143_v34 = vpop.permute.xlu1 %142  ;;  %v274_v36 = vrot.slane %v266_v33, %v159_v15  ;;  %239 = vrot.lane.b32.xlu0 %v237_v32, %s538_s2  ;;  %220 = vrot.lane.b32.xlu1 %v218_v29, %s538_s2 }
  0xb5   : > { %v146_v37 = vsel %vm145_vm0, %v374_v6, %v143_v34 }
  0xb6   : > { %148 = vst.msk [vmem:[%s131_s4] sm:$0x1] %vm147_vm1, %v146_v37  ;;  %v275_v38 = vcombine.high %v274_v36, %v536_v7 }
  0xb8   : > { %277 = vrot.lane.b32.xlu0 %v275_v38, %s538_s2  ;;  %258 = vrot.lane.b32.xlu1 %v256_v35, %s538_s2 }
 0x11e   : > { %v164_v39 = vpop.permute.xlu0 %163 }
 0x11f   : > { %v166_v40 = vsel %vm145_vm0, %v160_v18, %v164_v39 }
 0x120   : > { %167 = vst.msk [vmem:[%s131_s4 + $0x1] sm:$0x1] %vm147_vm1, %v166_v40 }
 0x122   : > { %v202_v41 = vpop.permute.xlu0 %201  ;;  %v183_v42 = vpop.permute.xlu1 %182 }
 0x123   : > { %v204_v43 = vsel %vm145_vm0, %v198_v19, %v202_v41  ;;  %v185_v44 = vsel %vm145_vm0, %v179_v24, %v183_v42 }
 0x124   : > { %205 = vst.msk [vmem:[%s131_s4 + $0x3] sm:$0x1] %vm147_vm1, %v204_v43  ;;  %186 = vst.msk [vmem:[%s131_s4 + $0x2] sm:$0x1] %vm147_vm1, %v185_v44 }
 0x126   : > { %v240_v45 = vpop.permute.xlu0 %239  ;;  %v221_v46 = vpop.permute.xlu1 %220 }
 0x127   : > { %v242_v47 = vsel %vm145_vm0, %v236_v30, %v240_v45  ;;  %v223_v48 = vsel %vm145_vm0, %v217_v25, %v221_v46 }
 0x128   : > { %243 = vst.msk [vmem:[%s131_s4 + $0x5] sm:$0x1] %vm147_vm1, %v242_v47  ;;  %224 = vst.msk [vmem:[%s131_s4 + $0x4] sm:$0x1] %vm147_vm1, %v223_v48 }
 0x12a   : > { %v278_v49 = vpop.permute.xlu0 %277  ;;  %v259_v50 = vpop.permute.xlu1 %258 }
 0x12b   : > { %v280_v51 = vsel %vm145_vm0, %v274_v36, %v278_v49  ;;  %v261_v52 = vsel %vm145_vm0, %v255_v31, %v259_v50 }
 0x12c   : > { %281 = vst.msk [vmem:[%s131_s4 + $0x7] sm:$0x1] %vm147_vm1, %v280_v51  ;;  %262 = vst.msk [vmem:[%s131_s4 + $0x6] sm:$0x1] %vm147_vm1, %v261_v52 }
 0x12d   : > { %476 = shalt.err (!%p473_p9)
}
 0x12e   : > { %s477_s25 = scalar_lea.hbm %s681_s16, 128  ;;  %s481_s27 = scalar_lea.hbm %s728_s1, 512 }
 0x12f   : > { %p478_p1 = scmp.ne.s32.totalorder %s681_s16, %s477_s25  ;;  %p482_p5 = scmp.lt.s32.totalorder %s681_s16, %s728_s1 }
 0x130   : > { %p483_p13 = scmp.lt.s32.totalorder %s481_s27, %s477_s25 }
 0x131   : > { %p479_p3 = pnand %p478_p1, %p739_p11 }
 0x132   : > { %p484_p6 = por %p483_p13, %p482_p5 }
 0x133   : > { %p480_p4 = pneg %p479_p3 }
 0x135   : > { %p485_p10 = pnand %p484_p6, %p480_p4 }
 0x137   : > { %488 = shalt.err (!%p485_p10)
}
 0x138   : > { %381 = dma.vmem_to_hbm [thread:$0]  (%p739_p11), %s683_s11, 128, %s681_s16, %s283_s10  }
 0x139 PF: > { %p392_p12 = scmp.ge.s32.totalorder %s527_s9, 2  ;;  %s308_s30 = sand.u32 1, %s515_s6  }
 0x13a   : > { %p740_p0 = scmp.ne.s32.totalorder %s734_s19, 0  ;;  %s309_s17 = scalar_lea.sflag [#allocation4], %s308_s30 }
 0x13c   : > { %p388_p2 = pnand %p392_p12, %p740_p0 }
 0x13e   : > { %p389_p7 = pneg %p388_p2 }
 0x140   : > { %510 = dma.done.wait (%p389_p7), %s309_s17, 128  }
 0x141   : > { %512 = vsyncadd (%p389_p7), %s309_s17, 4294967168  ;;  %p14_p8 = scmp.ge.s32.totalorder %s576_s12, 6   ;;  %s741_s6 = smov %s519_s7 }
 0x142   : > { %s742_s7 = smov %s523_s8  ;;  %s743_s8 = smov %s588_s15 }
 0x143   : > { %s744_s9 = smov %s576_s12  ;;  %16 = sbr.rel (!%p14_p8) target bundleno = 5 (0x5), region = 69 }
 0x148   :  { %314 = vsyncpa [#allocation3], 1 }
 0x149   :  { %316 = vsyncpa [#allocation3 + $0x1], 1 }
 0x14a   :  { %317 = vsyncpa [#allocation4], 1 }
 0x14b   :  { %319 = vsyncpa [#allocation4 + $0x1], 1 }

// kernel: tpu_custom_call.1
= control target key start
LH: loop header
LB: loop body
LE: loop exit
PB: predicated region body
PF: predicated region fallthrough
CT: control target
= control target key end

     0   :  { %6 = vsyncpa [#allocation3], 0  ;;  %s675_s0 = inlined_call_operand.hbm [shape: f32[4,2,8,8], index: 0, kind: input, shape index: {}]   ;;  %s676_s1 = inlined_call_operand.hbm [shape: f32[4,8,2,8], index: 1, kind: output, shape index: {}]  }
   0x1   :  { %8 = vsyncpa [#allocation3 + $0x1], 0 }
   0x2   :  { %9 = vsyncpa [#allocation4], 0 }
   0x3   :  { %11 = vsyncpa [#allocation4 + $0x1], 0  ;;  %s478_s6 = smov 0   ;;  %s480_s7 = smov 0  }
   0x4   :  { %s482_s8 = smov 0   ;;  %s484_s9 = smov 0  }
   0x5 LB: > { %s499_s10 = sadd.s32 4294967295, %s460_s9   ;;  %s295_s11 = sadd.s32 4294967294, %s460_s9   ;;  %s460_s9 = sphi %s484_s9, %s690_s9   ;;  %s456_s8 = sphi %s482_s8, %s689_s8   ;;  %s452_s7 = sphi %s480_s7, %s688_s7   ;;  %s448_s6 = sphi %s478_s6, %s687_s6  }
   0x6   : > { %s503_s12 = sadd.s32 1, %s460_s9   ;;  %s24_s13 = sadd.s32 1, %s456_s8 }
   0x7   : > { %s21_s14 = ssub.s32 %s460_s9, %s503_s12  ;;  %p31_p0 = scmp.ne.s32.totalorder %s456_s8, %s452_s7 }
   0x8   : > { %p22_p1 = scmp.eq.s32.totalorder %s21_s14, 0  ;;  %p32_p2 = scmp.eq.s32.totalorder %s460_s9, 0 }
   0x9   : > { %p37_p3 = scmp.ne.s32.totalorder %s452_s7, %s448_s6  ;;  %p38_p4 = scmp.eq.s32.totalorder %s499_s10, 0 }
   0xa   : > { %s515_s15 = scalar_select %p22_p1, %s456_s8, %s24_s13  }
   0xb   : > { %p517_p5 = por %p32_p2, %p31_p0  ;;  %p521_p6 = por %p38_p4, %p37_p3 }
   0xc   : > { %p61_p7 = scmp.eq.s32.totalorder %s499_s10, 3  ;;  %p67_p8 = scmp.eq.s32.totalorder %s295_s11, 3 }
   0xd   : > { %s680_s17 = scalar_select %p521_p6, 1, 0 }
   0xe   : > { %p330_p9 = scmp.lt.s32.totalorder %s460_s9, 4  ;;  %p527_p10 = por %p61_p7, %p31_p0 }
   0xf   : > { %p531_p11 = por %p67_p8, %p37_p3  ;;  %s87_s20 = sand.u32 1, %s456_s8  }
  0x10   : > { %s681_s18 = scalar_select %p527_p10, 1, 0 }
  0x11   : > { %s682_s19 = scalar_select %p531_p11, 1, 0 }
  0x12   : > { %s316_s21 = sshll.u32 %s460_s9, 8  ;;  %s298_s22 = sshll.u32 %s87_s20, 4 }
  0x13   : > { %s540_s25 = scalar_lea.hbm %s675_s0, %s316_s21  ;;  %s91_s26 = scalar_lea.vmem [#allocation2], %s298_s22 }
  0x14   : > { %s98_s27 = sshll.u32 %s91_s26, 4  ;;  %p544_p12 = pnand %p330_p9, %p517_p5  ;;  %s548_s27 = int_to_ptr.vmem [resolvable:$true] %s98_s27 }
  0x15   : > { %s550_s29 = scalar_lea.sflag [#allocation3], %s87_s20  ;;  %s368_s30 = scalar_lea.hbm %s540_s25, 256 }
  0x16   : > { %p369_p13 = scmp.ne.s32.totalorder %s540_s25, %s368_s30  ;;  %p370_p0 = pneg %p544_p12 }
  0x17   : > { %s373_s4 = scalar_lea.hbm %s675_s0, 1024  ;;  %p374_p3 = scmp.lt.s32.totalorder %s540_s25, %s675_s0 }
  0x18   : > { %p371_p1 = pnand %p370_p0, %p369_p13  ;;  %p375_p4 = scmp.lt.s32.totalorder %s373_s4, %s368_s30 }
  0x1a   : > { %p372_p2 = pneg %p371_p1  ;;  %p376_p5 = por %p375_p4, %p374_p3 }
  0x1c   : > { %p377_p7 = pnand %p376_p5, %p372_p2 }
  0x1e   : > { %380 = shalt.err (!%p377_p7)
}
  0x1f   : > { %s381_s13 = scalar_lea.vmem %s548_s27, 256  ;;  %s462_s14 = smov [#allocation2]  }
  0x20   : > { %p382_p8 = scmp.ne.s32.totalorder %s548_s27, %s381_s13  ;;  %s386_s16 = sshll.u32 %s462_s14, 4  ;;  %s387_s16 = int_to_ptr.vmem [resolvable:$false] %s386_s16 }
  0x21   : > { %s388_s20 = scalar_lea.vmem %s387_s16, 512  ;;  %p389_p1 = scmp.lt.s32.totalorder %s548_s27, %s387_s16 }
  0x22   : > { %p384_p9 = pnand %p382_p8, %p370_p0  ;;  %p390_p11 = scmp.lt.s32.totalorder %s388_s20, %s381_s13 }
  0x24   : > { %p385_p13 = pneg %p384_p9  ;;  %p391_p10 = por %p390_p11, %p389_p1 }
  0x26   : > { %p392_p6 = pnand %p391_p10, %p385_p13 }
  0x28   : > { %395 = shalt.err (!%p392_p6)
}
  0x29   : > { %s463_s21 = smov 128   ;;  %s464_s22 = smov 8  }
  0x2a   : > { %325 = dma.hbm_to_vmem [thread:$0]  (!%p544_p12), %s540_s25, 256, %s548_s27, %s550_s29, %s463_s21, %s463_s21, %s464_s22  }
  0x2b   : > { %p301_p0 = scmp.ge.s32.totalorder %s460_s9, 1  ;;  %p106_p2 = scmp.lt.s32.totalorder %s460_s9, 5 }
  0x2d   : > { %p107_p3 = pnand %p301_p0, %p106_p2 }
  0x2e   : > { %s574_s23 = sand.u32 (!%p107_p3), 1, %s452_s7   ;;  %p684_p6 = scmp.ne.s32.totalorder (!%p107_p3), %s680_s17, 0 }
  0x2f   : > { %110 = sbr.rel (%p107_p3) target bundleno = 84 (0x54), region = 24  ;;  %s302_s24 = sshll.u32 (!%p107_p3), %s574_s23, 4 }
  0x30   : > { %s113_s26 = scalar_lea.sflag (!%p107_p3), [#allocation3], %s574_s23  ;;  %s578_s30 = scalar_lea.vmem (!%p107_p3), [#allocation2], %s302_s24 }
  0x34   : > { %439 = dma.done.wait (%p684_p6), %s113_s26, 256  }
  0x35   : > { %441 = vsyncadd (%p684_p6), %s113_s26, 4294967040  ;;  %v135_v0 = vld [vmem:[%s578_s30] sm:$0x1]  ;;  %v136_v1 = vld [vmem:[%s578_s30 + $0x8] sm:$0x1]  ;;  %vm140_vm0 = vcmask 1041409  }
  0x36   : > { %v139_v2 = vrot.slane %v136_v1, 7  ;;  %vm143_vm1 = vcmask 58368   ;;  %v145_v3 = vld [vmem:[%s578_s30 + $0x1] sm:$0x1]  ;;  %v146_v4 = vld [vmem:[%s578_s30 + $0x9] sm:$0x1] }
  0x37   : > { %v149_v5 = vrot.slane %v146_v4, 7  ;;  %v154_v6 = vld [vmem:[%s578_s30 + $0x2] sm:$0x1]  ;;  %v155_v7 = vld [vmem:[%s578_s30 + $0xa] sm:$0x1]  ;;  %s593_s17 = scalar_lea.vmem [#allocation5], %s302_s24 }
  0x38   : > { %v141_v8 = vsel %vm140_vm0, %v139_v2, %v135_v0  ;;  %v158_v9 = vrot.slane %v155_v7, 7  ;;  %v163_v10 = vld [vmem:[%s578_s30 + $0x3] sm:$0x1]  ;;  %v164_v11 = vld [vmem:[%s578_s30 + $0xb] sm:$0x1]  ;;  %s222_s25 = sshll.u32 %s593_s17, 4  ;;  %s617_s25 = int_to_ptr.vmem [resolvable:$true] %s222_s25 }
  0x39   : > { %144 = vst.msk [vmem:[%s593_s17] sm:$0x3] %vm143_vm1, %v141_v8  ;;  %v150_v12 = vsel %vm140_vm0, %v149_v5, %v145_v3  ;;  %v167_v13 = vrot.slane %v164_v11, 7  ;;  %v172_v14 = vld [vmem:[%s578_s30 + $0x4] sm:$0x1]  ;;  %s317_s27 = sshll.u32 %s499_s10, 8 }
  0x3a   : > { %v173_v15 = vld [vmem:[%s578_s30 + $0xc] sm:$0x1]  ;;  %304 = vst.msk [vmem:[%s593_s17 + $0x2] sm:$0x3] %vm143_vm1, %v150_v12  ;;  %v159_v16 = vsel %vm140_vm0, %v158_v9, %v154_v6  ;;  %v181_v18 = vld [vmem:[%s578_s30 + $0x5] sm:$0x1]  ;;  %s625_s29 = scalar_lea.hbm %s676_s1, %s317_s27 }
  0x3b   : > { %v176_v17 = vrot.slane %v173_v15, 7  ;;  %v182_v19 = vld [vmem:[%s578_s30 + $0xd] sm:$0x1]  ;;  %305 = vst.msk [vmem:[%s593_s17 + $0x4] sm:$0x3] %vm143_vm1, %v159_v16  ;;  %v168_v20 = vsel %vm140_vm0, %v167_v13, %v163_v10  ;;  %s209_s2 = scalar_lea.sflag [#allocation4], %s574_s23 }
  0x3c   : > { %v185_v21 = vrot.slane %v182_v19, 7  ;;  %v190_v22 = vld [vmem:[%s578_s30 + $0x6] sm:$0x1]  ;;  %v191_v23 = vld [vmem:[%s578_s30 + $0xe] sm:$0x1]  ;;  %s396_s3 = scalar_lea.vmem %s617_s25, 256 }
  0x3d   : > { %306 = vst.msk [vmem:[%s593_s17 + $0x6] sm:$0x3] %vm143_vm1, %v168_v20  ;;  %v177_v24 = vsel %vm140_vm0, %v176_v17, %v172_v14  ;;  %v194_v25 = vrot.slane %v191_v23, 7  ;;  %v199_v26 = vld [vmem:[%s578_s30 + $0x7] sm:$0x1]  ;;  %p397_p10 = scmp.ne.s32.totalorder %s617_s25, %s396_s3  ;;  %p685_p11 = scmp.ne.s32.totalorder %s681_s18, 0 }
  0x3e   : > { %v200_v27 = vld [vmem:[%s578_s30 + $0xf] sm:$0x1]  ;;  %307 = vst.msk [vmem:[%s593_s17 + $0x8] sm:$0x3] %vm143_vm1, %v177_v24  ;;  %v186_v28 = vsel %vm140_vm0, %v185_v21, %v181_v18  ;;  %s465_s4 = smov [#allocation5]  }
  0x3f   : > { %v203_v29 = vrot.slane %v200_v27, 7  ;;  %308 = vst.msk [vmem:[%s593_s17 + $0xa] sm:$0x3] %vm143_vm1, %v186_v28  ;;  %v195_v30 = vsel %vm140_vm0, %v194_v25, %v190_v22  ;;  %p398_p12 = pnand %p397_p10, %p685_p11  ;;  %s400_s5 = sshll.u32 %s465_s4, 4  ;;  %s401_s5 = int_to_ptr.vmem [resolvable:$false] %s400_s5 }
  0x40   : > { %309 = vst.msk [vmem:[%s593_s17 + $0xc] sm:$0x3] %vm143_vm1, %v195_v30  ;;  %s402_s11 = scalar_lea.vmem %s401_s5, 512  ;;  %p403_p5 = scmp.lt.s32.totalorder %s617_s25, %s401_s5 }
  0x41   : > { %v204_v31 = vsel %vm140_vm0, %v203_v29, %v199_v26  ;;  %p399_p4 = pneg %p398_p12  ;;  %p404_p7 = scmp.lt.s32.totalorder %s402_s11, %s396_s3 }
  0x42   : > { %310 = vst.msk [vmem:[%s593_s17 + $0xe] sm:$0x3] %vm143_vm1, %v204_v31 }
  0x43   : > { %p405_p8 = por %p404_p7, %p403_p5 }
  0x45   : > { %p406_p9 = pnand %p405_p8, %p399_p4 }
  0x47   : > { %409 = shalt.err (!%p406_p9)
}
  0x48   : > { %s410_s13 = scalar_lea.hbm %s625_s29, 256  ;;  %s414_s20 = scalar_lea.hbm %s676_s1, 1024 }
  0x49   : > { %p411_p13 = scmp.ne.s32.totalorder %s625_s29, %s410_s13  ;;  %p415_p2 = scmp.lt.s32.totalorder %s625_s29, %s676_s1 }
  0x4a   : > { %p416_p3 = scmp.lt.s32.totalorder %s414_s20, %s410_s13 }
  0x4b   : > { %p412_p1 = pnand %p411_p13, %p685_p11 }
  0x4c   : > { %p417_p6 = por %p416_p3, %p415_p2 }
  0x4d   : > { %p413_p0 = pneg %p412_p1 }
  0x4f   : > { %p418_p10 = pnand %p417_p6, %p413_p0 }
  0x51   : > { %421 = shalt.err (!%p418_p10)
}
  0x52   : > { %s466_s24 = smov 32   ;;  %s467_s26 = smov 2  }
  0x53   : > { %320 = dma.vmem_to_hbm [thread:$0]  (%p685_p11), %s617_s25, 256, %s625_s29, %s209_s2, %s466_s24, %s466_s24, %s467_s26  }
  0x54 PF: > { %p331_p12 = scmp.ge.s32.totalorder %s460_s9, 2  ;;  %s237_s30 = sand.u32 1, %s448_s6  }
  0x55   : > { %p686_p4 = scmp.ne.s32.totalorder %s682_s19, 0  ;;  %s238_s17 = scalar_lea.sflag [#allocation4], %s237_s30 }
  0x57   : > { %p327_p5 = pnand %p331_p12, %p686_p4 }
  0x59   : > { %p328_p7 = pneg %p327_p5 }
  0x5b   : > { %443 = dma.done.wait (%p328_p7), %s238_s17, 256  }
  0x5c   : > { %445 = vsyncadd (%p328_p7), %s238_s17, 4294967040  ;;  %p14_p8 = scmp.ge.s32.totalorder %s503_s12, 6   ;;  %s687_s6 = smov %s452_s7 }
  0x5d   : > { %s688_s7 = smov %s456_s8  ;;  %s689_s8 = smov %s515_s15 }
  0x5e   : > { %s690_s9 = smov %s503_s12  ;;  %16 = sbr.rel (!%p14_p8) target bundleno = 5 (0x5), region = 76 }
  0x63   :  { %243 = vsyncpa [#allocation3], 1 }
  0x64   :  { %245 = vsyncpa [#allocation3 + $0x1], 1 }
  0x65   :  { %246 = vsyncpa [#allocation4], 1 }
  0x66   :  { %248 = vsyncpa [#allocation4 + $0x1], 1 }

</bundles_post_ra>
